<compile_context>
chip_gen: v6e
topology: v6e:2x2x1
jax: 0.10.0
libtpu: 0.0.40
codegen_flags: <defaults>
</compile_context>

<pallas_src>
import functools

import jax
import jax.numpy as jnp
from jax import lax
from jax.experimental import pallas as pl
from jax.experimental.pallas import tpu as pltpu


# Contract LHS axis 0 with RHS axis 0: out[t, c] = sum_k y[k, t] * eye[k, c].
_TRANS_LHS_DIM_NUMBERS = (((0,), (0,)), ((), ()))


def _mxu_transpose(y, eye):
    """(C, T) -> (T, C) on the (otherwise idle) MXU via an identity matmul.

    `eye` is a VMEM-resident (C, C) identity in the data dtype.  For bf16 data
    this is bit-exact (bf16 * 1.0 accumulated in f32); for f32 data Mosaic's
    multi-pass f32 matmul keeps the relative error at f32-level (it is not
    guaranteed bit-exact, hence the small tolerances in the demo asserts).
    """
    return lax.dot_general(
        y, eye,
        dimension_numbers=_TRANS_LHS_DIM_NUMBERS,
        preferred_element_type=jnp.float32,
    )


def _patch_embed_norm_kernel(x_ref, eye_ref, gamma_ref, beta_ref, o_ref, *, eps):
    # x_ref:     (C, tHW)  pre-transpose tile (input dtype)
    # eye_ref:   (C, C)    identity, input dtype, VMEM-resident across steps
    # gamma_ref: (1, C)    f32, VMEM-resident (lane-aligned row)
    # beta_ref:  (1, C)    f32, VMEM-resident (lane-aligned row)
    # o_ref:     (tHW, C)
    x = x_ref[...].astype(jnp.float32)                       # stats in f32 (VPU)
    mean = jnp.mean(x, axis=0, keepdims=True)                # sublane reduce
    centered = x - mean
    var = jnp.mean(centered * centered, axis=0, keepdims=True)
    inv = lax.rsqrt(var + eps)                               # EUP
    # Cast first, then transpose on the MXU (keeps XLU free); affine applied
    # post-transpose as (1, C) rows -> plain lane-aligned broadcast.
    yn = (centered * inv).astype(eye_ref.dtype)              # (C, tHW)
    ynt = _mxu_transpose(yn, eye_ref[...])                   # (tHW, C) f32
    o_ref[...] = (ynt * gamma_ref[...] + beta_ref[...]).astype(o_ref.dtype)


def _patch_embed_plain_kernel(x_ref, eye_ref, o_ref):
    # norm_layer is None: pure flatten + transpose (transpose on the MXU).
    o_ref[...] = _mxu_transpose(x_ref[...], eye_ref[...]).astype(o_ref.dtype)


def _choose_thw(HW, C, itemsize, *, max_thw=1024, vmem_budget=12 << 20):
    """Token-tile width: biggest multiple of 128 within the VMEM budget.

    Budget per token column covers double-buffered input + output tiles
    (2 * 2 * itemsize bytes) plus ~4 full-tile f32 intermediates materialized
    inside the kernel (x_f32, centered, normalized, transposed).  Capped at
    `max_thw` (HBM-roofline fraction plateaus by tile 512-1024).  If HW is
    smaller than the cap a single full-HW block is used (always legal); larger
    HW uses a cdiv grid with a ragged last tile.
    """
    per_token = C * (4 * itemsize + 4 * 4)
    cap = (vmem_budget // per_token) // 128 * 128
    cap = min(cap, (max_thw // 128) * 128)
    cap = max(cap, 128)
    if HW <= cap:
        return HW
    return cap


def _vmem_limit_bytes(tHW, C, itemsize):
    """Derived VMEM limit: working set * 2 headroom, clamped to [16, 32] MiB."""
    est = tHW * C * (4 * itemsize + 4 * 4) + C * C * itemsize + 2 * C * 4
    return int(min(max(2 * est, 16 << 20), 32 << 20))


def patch_embed(x, gamma=None, beta=None, *, eps=1e-5, max_thw=1024):
    """PatchEmbed.forward: (B, C, H, W) -> (B, H*W, C), optional LayerNorm(C)."""
    B, C, H, W = x.shape
    HW = H * W
    x2 = x.reshape(B, C, HW)                      # flatten(2): free, no data movement
    itemsize = x.dtype.itemsize
    tHW = _choose_thw(HW, C, itemsize, max_thw=max_thw)
    n_t = pl.cdiv(HW, tHW)                        # ragged last tile allowed
    grid = (B, n_t)
    out_shape = jax.ShapeDtypeStruct((B, HW, C), x.dtype)

    x_spec = pl.BlockSpec((pl.Squeezed(), C, tHW), lambda b, t: (b, 0, t))
    o_spec = pl.BlockSpec((pl.Squeezed(), tHW, C), lambda b, t: (b, t, 0))
    eye_spec = pl.BlockSpec((C, C), lambda b, t: (0, 0))      # VMEM-resident
    # TODO(synk): use pltpu.CORE_PARALLEL on the leading axis for real v7x
    # 2-TensorCore sharding; plain "parallel" is kept here (harmless).
    cparams = pltpu.CompilerParams(
        dimension_semantics=("parallel", "parallel"),
        vmem_limit_bytes=_vmem_limit_bytes(tHW, C, itemsize),
    )
    eye = jnp.eye(C, dtype=x.dtype)

    if gamma is None:
        cost = pl.CostEstimate(
            flops=2 * B * HW * C * C,             # MXU identity transpose
            transcendentals=0,
            bytes_accessed=2 * B * C * HW * itemsize + C * C * itemsize,
        )
        return pl.pallas_call(
            _patch_embed_plain_kernel,
            out_shape=out_shape,
            grid=grid,
            in_specs=[x_spec, eye_spec],
            out_specs=o_spec,
            compiler_params=cparams,
            cost_estimate=cost,
        )(x2, eye)

    assert beta is not None, "LayerNorm path needs both gamma and beta"
    gamma_row = gamma.reshape(1, C).astype(jnp.float32)
    beta_row = beta.reshape(1, C).astype(jnp.float32)
    param_spec = pl.BlockSpec((1, C), lambda b, t: (0, 0))    # VMEM-resident
    cost = pl.CostEstimate(
        flops=2 * B * HW * C * C + 8 * B * HW * C,
        transcendentals=B * HW,
        bytes_accessed=2 * B * C * HW * itemsize + C * C * itemsize + 2 * C * 4,
    )
    kernel = functools.partial(_patch_embed_norm_kernel, eps=eps)
    return pl.pallas_call(
        kernel,
        out_shape=out_shape,
        grid=grid,
        in_specs=[x_spec, eye_spec, param_spec, param_spec],
        out_specs=o_spec,
        compiler_params=cparams,
        cost_estimate=cost,
    )(x2, eye, gamma_row, beta_row)


def patch_embed_ref(x, gamma=None, beta=None, *, eps=1e-5):
    B, C, H, W = x.shape
    y = jnp.transpose(x.reshape(B, C, H * W), (0, 2, 1))      # (B, HW, C)
    if gamma is None:
        return y
    yf = y.astype(jnp.float32)
    mean = jnp.mean(yf, axis=-1, keepdims=True)
    var = jnp.mean((yf - mean) ** 2, axis=-1, keepdims=True)
    yn = (yf - mean) * lax.rsqrt(var + eps) * gamma + beta
    return yn.astype(x.dtype)


if __name__ == "__main__":
    key = jax.random.PRNGKey(0)
    k1, k2, k3, k4, k5 = jax.random.split(key, 5)

    # Case A: embed_dim = 128 (lane-dense output), 16x16 token grid, LayerNorm.
    B, C, H, W = 2, 128, 16, 16
    x = jax.random.normal(k1, (B, C, H, W), dtype=jnp.float32)
    gamma = 1.0 + 0.1 * jax.random.normal(k2, (C,), dtype=jnp.float32)
    beta = 0.1 * jax.random.normal(k3, (C,), dtype=jnp.float32)
    out_norm = jax.block_until_ready(patch_embed(x, gamma, beta))
    ref_norm = patch_embed_ref(x, gamma, beta)
    assert out_norm.shape == (B, H * W, C)
    # MXU multi-pass f32 transpose is f32-accurate but not guaranteed bit-exact.
    assert jnp.allclose(out_norm, ref_norm, atol=1e-4, rtol=1e-4)

    # Case B: norm_layer=None path (pure flatten + transpose).
    out_plain = jax.block_until_ready(patch_embed(x))
    ref_plain = patch_embed_ref(x)
    assert out_plain.shape == (B, H * W, C)
    assert jnp.allclose(out_plain, ref_plain, atol=1e-4, rtol=1e-4)

    # Case C: module-default embed_dim=96, 14x14 token grid (HW=196, not a
    # multiple of 128), with a forced small token tile so the cdiv grid with a
    # ragged last tile is exercised.
    B2, C2, H2, W2 = 2, 96, 14, 14
    x2 = jax.random.normal(k4, (B2, C2, H2, W2), dtype=jnp.float32)
    gamma2 = 1.0 + 0.1 * jax.random.normal(k5, (C2,), dtype=jnp.float32)
    beta2 = 0.05 * jnp.ones((C2,), dtype=jnp.float32)
    out2 = jax.block_until_ready(patch_embed(x2, gamma2, beta2, max_thw=128))
    ref2 = patch_embed_ref(x2, gamma2, beta2)
    assert out2.shape == (B2, H2 * W2, C2)
    assert jnp.allclose(out2, ref2, atol=1e-4, rtol=1e-4)

    print("KERNEL_OK")
</pallas_src>

<mosaic_0001>
module attributes {stable_mosaic.version = 11 : i64} {
  func.func @_patch_embed_norm_kernel(%arg0: i32, %arg1: i32, %arg2: memref<1x128x256xf32, #tpu.memory_space<vmem>>, %arg3: memref<128x128xf32, #tpu.memory_space<vmem>>, %arg4: memref<1x128xf32, #tpu.memory_space<vmem>>, %arg5: memref<1x128xf32, #tpu.memory_space<vmem>>, %arg6: memref<1x256x128xf32, #tpu.memory_space<vmem>>) attributes {dimension_semantics = [#tpu.dimension_semantics<parallel>, #tpu.dimension_semantics<parallel>], iteration_bounds = array<i64: 2, 1>, scalar_prefetch = 0 : i64, scratch_operands = 0 : i64, tpu.core_type = #tpu.core_type<tc>, window_params = [{transform_indices = @transform_0, window_bounds = array<i64: 1, 128, 256>}, {pipeline_mode = #tpu.pipeline_mode<synchronous>, transform_indices = @transform_1, window_bounds = array<i64: 128, 128>}, {pipeline_mode = #tpu.pipeline_mode<synchronous>, transform_indices = @transform_2, window_bounds = array<i64: 1, 128>}, {pipeline_mode = #tpu.pipeline_mode<synchronous>, transform_indices = @transform_3, window_bounds = array<i64: 1, 128>}, {transform_indices = @transform_4, window_bounds = array<i64: 1, 256, 128>}]} {
    %c0 = arith.constant 0 : index
    %c0_0 = arith.constant 0 : index
    %c0_1 = arith.constant 0 : index
    %0 = vector.load %arg2[%c0, %c0_0, %c0_1] : memref<1x128x256xf32, #tpu.memory_space<vmem>>, vector<1x128x256xf32>
    %1 = vector.shape_cast %0 : vector<1x128x256xf32> to vector<128x256xf32>
    %cst = arith.constant dense<0.000000e+00> : vector<256xf32>
    %2 = vector.multi_reduction <add>, %1, %cst [0] : vector<128x256xf32> to vector<256xf32>
    %3 = vector.shape_cast %2 : vector<256xf32> to vector<1x256xf32>
    %cst_2 = arith.constant 1.280000e+02 : f32
    %4 = vector.broadcast %cst_2 : f32 to vector<1x256xf32>
    %5 = arith.divf %3, %4 : vector<1x256xf32>
    %6 = vector.broadcast %5 : vector<1x256xf32> to vector<128x256xf32>
    %7 = arith.subf %1, %6 : vector<128x256xf32>
    %8 = arith.mulf %7, %7 : vector<128x256xf32>
    %cst_3 = arith.constant dense<0.000000e+00> : vector<256xf32>
    %9 = vector.multi_reduction <add>, %8, %cst_3 [0] : vector<128x256xf32> to vector<256xf32>
    %10 = vector.shape_cast %9 : vector<256xf32> to vector<1x256xf32>
    %cst_4 = arith.constant 1.280000e+02 : f32
    %11 = vector.broadcast %cst_4 : f32 to vector<1x256xf32>
    %12 = arith.divf %10, %11 : vector<1x256xf32>
    %cst_5 = arith.constant 9.99999974E-6 : f32
    %13 = vector.broadcast %cst_5 : f32 to vector<1x256xf32>
    %14 = arith.addf %12, %13 : vector<1x256xf32>
    %15 = math.rsqrt %14 : vector<1x256xf32>
    %16 = vector.broadcast %15 : vector<1x256xf32> to vector<128x256xf32>
    %17 = arith.mulf %7, %16 : vector<128x256xf32>
    %c0_6 = arith.constant 0 : index
    %c0_7 = arith.constant 0 : index
    %18 = vector.load %arg3[%c0_6, %c0_7] : memref<128x128xf32, #tpu.memory_space<vmem>>, vector<128x128xf32>
    %cst_8 = arith.constant dense<0.000000e+00> : vector<256x128xf32>
    %19 = tpu.matmul %17, %18, %cst_8 {dimension_numbers = #tpu.dot_dimension_numbers<[0], [0], [1], [1], [0, 1, 1, 1], [], []>} : vector<128x256xf32>, vector<128x128xf32>, vector<256x128xf32> -> vector<256x128xf32>
    %c0_9 = arith.constant 0 : index
    %c0_10 = arith.constant 0 : index
    %20 = vector.load %arg4[%c0_9, %c0_10] : memref<1x128xf32, #tpu.memory_space<vmem>>, vector<1x128xf32>
    %21 = vector.broadcast %20 : vector<1x128xf32> to vector<256x128xf32>
    %22 = arith.mulf %19, %21 : vector<256x128xf32>
    %c0_11 = arith.constant 0 : index
    %c0_12 = arith.constant 0 : index
    %23 = vector.load %arg5[%c0_11, %c0_12] : memref<1x128xf32, #tpu.memory_space<vmem>>, vector<1x128xf32>
    %24 = vector.broadcast %23 : vector<1x128xf32> to vector<256x128xf32>
    %25 = arith.addf %22, %24 : vector<256x128xf32>
    %c0_13 = arith.constant 0 : index
    %c0_14 = arith.constant 0 : index
    %c0_15 = arith.constant 0 : index
    %26 = vector.load %arg6[%c0_13, %c0_14, %c0_15] : memref<1x256x128xf32, #tpu.memory_space<vmem>>, vector<1x256x128xf32>
    %27 = vector.shape_cast %26 : vector<1x256x128xf32> to vector<256x128xf32>
    %28 = vector.shape_cast %25 : vector<256x128xf32> to vector<1x256x128xf32>
    tpu.vector_store %arg6[%c0_13, %c0_14, %c0_15], %28 {strides = array<i32>} : memref<1x256x128xf32, #tpu.memory_space<vmem>>, vector<1x256x128xf32>,
    return
  }
  func.func @transform_0(%arg0: i32, %arg1: i32) -> (i32, i32, i32) {
    %c0_i32 = arith.constant 0 : i32
    %c0_i32_0 = arith.constant 0 : i32
    return %arg0, %c0_i32, %arg1 : i32, i32, i32
  }
  func.func @transform_1(%arg0: i32, %arg1: i32) -> (i32, i32) {
    %c0_i32 = arith.constant 0 : i32
    %c0_i32_0 = arith.constant 0 : i32
    %c0_i32_1 = arith.constant 0 : i32
    return %c0_i32, %c0_i32_0 : i32, i32
  }
  func.func @transform_2(%arg0: i32, %arg1: i32) -> (i32, i32) {
    %c0_i32 = arith.constant 0 : i32
    %c0_i32_0 = arith.constant 0 : i32
    %c0_i32_1 = arith.constant 0 : i32
    return %c0_i32, %c0_i32_0 : i32, i32
  }
  func.func @transform_3(%arg0: i32, %arg1: i32) -> (i32, i32) {
    %c0_i32 = arith.constant 0 : i32
    %c0_i32_0 = arith.constant 0 : i32
    %c0_i32_1 = arith.constant 0 : i32
    return %c0_i32, %c0_i32_0 : i32, i32
  }
  func.func @transform_4(%arg0: i32, %arg1: i32) -> (i32, i32, i32) {
    %c0_i32 = arith.constant 0 : i32
    %c0_i32_0 = arith.constant 0 : i32
    return %arg0, %arg1, %c0_i32 : i32, i32, i32
  }
}

</mosaic_0001>

<bundles_post_ra>
// kernel: tpu_custom_call.1
= control target key start
LH: loop header
LB: loop body
LE: loop exit
PB: predicated region body
PF: predicated region fallthrough
CT: control target
= control target key end

     0   :  { %s2238_s0 = inlined_call_operand.hbm [shape: f32[2,128,256], index: 0, kind: input, shape index: {}]   ;;  %s2239_s1 = inlined_call_operand.hbm [shape: f32[128,128], index: 1, kind: input, shape index: {}]   ;;  %s2240_s2 = inlined_call_operand.vmem [shape: f32[1,128], index: 2, kind: input, shape index: {}]   ;;  %s2241_s3 = inlined_call_operand.vmem [shape: f32[1,128], index: 3, kind: input, shape index: {}]   ;;  %s2242_s4 = inlined_call_operand.hbm [shape: f32[2,256,128], index: 4, kind: output, shape index: {}]  }
   0x1   :  { %2244 = sst [smem:[#allocation11_spill]] %s2239_s1 }
   0x2   :  { %9 = vsyncpa [#allocation3], 0 }
   0x3   :  { %11 = vsyncpa [#allocation3 + $0x1], 0 }
   0x4   :  { %12 = vsyncpa [#allocation6], 0 }
   0x5   :  { %13 = vsyncpa [#allocation4], 0 }
   0x6   :  { %15 = vsyncpa [#allocation4 + $0x1], 0  ;;  %s1550_s15 = smov 0   ;;  %s1552_s16 = smov 0  }
   0x7   :  { %s1554_s17 = smov 0   ;;  %s1556_s18 = smov 0  }
   0x8   :  { %s1558_s19 = smov 0   ;;  %s1560_s20 = smov 0  }
   0x9 LB: > { %s1000_s21 = sadd.s32 4294967295, %s1514_s20   ;;  %s1001_s22 = sadd.s32 4294967294, %s1514_s20   ;;  %s1514_s20 = sphi %s1560_s20, %s21_s20   ;;  %s1510_s19 = sphi %s1558_s19, %s2262_s19   ;;  %s1506_s18 = sphi %s1556_s18, %s2261_s18   ;;  %s1502_s17 = sphi %s1554_s17, %s2260_s17   ;;  %s1498_s16 = sphi %s1552_s16, %s2259_s16   ;;  %s1494_s15 = sphi %s1550_s15, %s2258_s15  }
   0xa   : > { %p55_p0 = scmp.ne.s32.totalorder %s1498_s16, %s1494_s15  ;;  %p1584_p1 = scmp.eq.s32.totalorder %s1000_s21, 0 }
   0xb   : > { %p1588_p2 = scmp.eq.s32.totalorder %s1000_s21, 1  ;;  %p150_p3 = scmp.eq.s32.totalorder %s1001_s22, 1 }
   0xc   : > { %p1594_p4 = por %p1584_p1, %p55_p0  ;;  %p1002_p5 = scmp.ge.s32.totalorder %s1514_s20, 1 }
   0xd   : > { %p1599_p6 = por %p150_p3, %p55_p0  ;;  %p157_p7 = scmp.lt.s32.totalorder %s1514_s20, 3 }
   0xe   : > { %s2247_s25 = scalar_select %p1594_p4, 1, 0 }
   0xf   : > { %s2248_s26 = scalar_select %p1599_p6, 1, 0 }
  0x10   : > { %p1604_p8 = pnand %p1002_p5, %p157_p7  ;;  %s1516_s28 = smov [#allocation5]  }
  0x11   : > { %s169_s29 = sshll.u32 %s1516_s28, 4  ;;  %s33_s5 = sadd.s32 1, %s1510_s19  ;;  %s170_s29 = int_to_ptr.vmem [resolvable:$true] %s169_s29 }
  0x12   : > { %p1189_p9 = pneg %p1604_p8  ;;  %s1387_s6 = scalar_lea.vmem %s170_s29, 2048 }
  0x13   : > { %p1388_p13 = scmp.ne.s32.totalorder %s170_s29, %s1387_s6  ;;  %p1395_p5 = scmp.lt.s32.totalorder %s170_s29, %s170_s29 }
  0x14   : > { %p1613_p11 = pnand %p1189_p9, %p1584_p1  ;;  %p1396_p7 = scmp.lt.s32.totalorder %s1387_s6, %s1387_s6 }
  0x16   : > { %p1378_p12 = pneg %p1613_p11  ;;  %p1397_p6 = por %p1396_p7, %p1395_p5 }
  0x18   : > { %p1390_p0 = pnand %p1388_p13, %p1378_p12 }
  0x1a   : > { %p1391_p3 = pneg %p1390_p0 }
  0x1c   : > { %p1398_p4 = pnand %p1397_p6, %p1391_p3 }
  0x1e   : > { %1401 = shalt.err (!%p1398_p4)
}
  0x1f   : > { %s1517_s7 = smov 128   ;;  %s1518_s8 = smov 8  }
  0x20   : > { %s2251_s1 = sld [smem:[#allocation11_spill]]  ;;  %p35_p6 = scmp.ge.s32.totalorder %s33_s5, 2 }
  0x21   : > { %s42_s11 = sadd.s32 1, %s1502_s17  ;;  %p49_p4 = scmp.ne.s32.totalorder %s1502_s17, %s1498_s16 }
  0x22   : > { %p50_p9 = scmp.eq.s32.totalorder %s1514_s20, 0  ;;  %s2264_s5 = smov (%p35_p6, %s33_s5), 0 }
  0x23   : > { %p1637_p13 = por %p1588_p2, %p49_p4  ;;  %s37_s14 = ssub.s32 %s1510_s19, %s2264_s5 }
  0x24   : > { %p1631_p12 = por %p50_p9, %p49_p4  ;;  %p1202_p0 = scmp.lt.s32.totalorder %s1514_s20, 2 }
  0x25   : > { %s189_s21 = sand.u32 1, %s1502_s17  }
  0x26   : > { %1192 = dma.hbm_to_vmem [thread:$0]  (!%p1613_p11), %s2251_s1, 2048, %s170_s29, [#allocation6], %s1517_s7, %s1517_s7, %s1518_s8  }
  0x27   : > { %p40_p11 = scmp.eq.s32.totalorder %s37_s14, 0  ;;  %s1005_s22 = sshll.u32 %s189_s21, 8 }
  0x28   : > { %s1019_s29 = sshll.u32 %s1510_s19, 12  ;;  %s193_s8 = scalar_lea.vmem [#allocation2], %s1005_s22 }
  0x29   : > { %s1646_s28 = scalar_select %p40_p11, %s1502_s17, %s42_s11  }
  0x2a   : > { %s201_s7 = scalar_lea.hbm %s2238_s0, %s1019_s29  ;;  %s202_s9 = sshll.u32 %s193_s8, 4  ;;  %s203_s9 = int_to_ptr.vmem [resolvable:$true] %s202_s9 }
  0x2b   : > { %p1654_p2 = pnand %p1202_p0, %p1631_p12  ;;  %s190_s10 = scalar_lea.sflag [#allocation3], %s189_s21 }
  0x2c   : > { %s1415_s14 = scalar_lea.vmem %s203_s9, 4096  ;;  %s1519_s11 = smov [#allocation2]  }
  0x2d   : > { %p1404_p3 = pneg %p1654_p2  ;;  %p1416_p5 = scmp.ne.s32.totalorder %s203_s9, %s1415_s14 }
  0x2e   : > { %s1420_s1 = sshll.u32 %s1519_s11, 4  ;;  %s1421_s1 = int_to_ptr.vmem [resolvable:$false] %s1420_s1 }
  0x2f   : > { %p1418_p7 = pnand %p1416_p5, %p1404_p3  ;;  %s1422_s29 = scalar_lea.vmem %s1421_s1, 8192 }
  0x30   : > { %p1423_p4 = scmp.lt.s32.totalorder %s203_s9, %s1421_s1  ;;  %p1424_p9 = scmp.lt.s32.totalorder %s1422_s29, %s1415_s14 }
  0x31   : > { %p1419_p6 = pneg %p1418_p7 }
  0x32   : > { %p1425_p11 = por %p1424_p9, %p1423_p4 }
  0x34   : > { %p1426_p10 = pnand %p1425_p11, %p1419_p6 }
  0x36   : > { %1429 = shalt.err (!%p1426_p10)
}
  0x37   : > { %s1520_s12 = smov 256   ;;  %s1521_s22 = smov 16  }
  0x38   : > { %1196 = dma.hbm_to_vmem [thread:$0]  (!%p1654_p2), %s201_s7, 4096, %s203_s9, %s190_s10, %s1520_s12, %s1520_s12, %s1521_s22  }
  0x39   : > { %214 = sbr.rel (%p1604_p8) target bundleno = 581 (0x245), region = 36  ;;  %s1665_s21 = sand.u32 (!%p1604_p8), 1, %s1498_s16  }
  0x3a   : > { %s1009_s1 = sshll.u32 (!%p1604_p8), %s1665_s21, 8  ;;  %s217_s30 = scalar_lea.sflag (!%p1604_p8), [#allocation3], %s1665_s21 }
  0x3b   : > { %s1671_s6 = scalar_lea.vmem (!%p1604_p8), [#allocation2], %s1009_s1  ;;  %p2255_p10 = scmp.ne.s32.totalorder (!%p1604_p8), %s2247_s25, 0 }
  0x3e   : > { %1481 = dma.done.wait (%p2255_p10), %s217_s30, 4096  }
  0x3f   : > { %1483 = vsyncadd (%p2255_p10), %s217_s30, 4294963200 }
  0x40   : > { %1485 = dma.done.wait (%p1584_p1), [#allocation6], 2048  }
  0x41   : > { %1487 = vsyncadd (%p1584_p1), [#allocation6], 4294965248  ;;  %v1682_v0 = vld [vmem:[%s1671_s6] sm:$0xff]  ;;  %v1685_v1 = vld [vmem:[%s1671_s6 + $0x8] sm:$0xff]  ;;  %s2091_s8 = scalar_lea.vmem [#allocation7], %s1009_s1  ;;  %s1020_s9 = sshll.u32 %s1506_s18, 12 }
  0x42   : > { %v1688_v2 = vld [vmem:[%s1671_s6 + $0x10] sm:$0xff]  ;;  %v1691_v3 = vld [vmem:[%s1671_s6 + $0x18] sm:$0xff]  ;;  %v1694_v4 = vld [vmem:[%s1671_s6 + $0x20] sm:$0xff]  ;;  %s903_s24 = sshll.u32 %s2091_s8, 4  ;;  %s2182_s11 = scalar_lea.hbm %s2242_s4, %s1020_s9  ;;  %s2184_s24 = int_to_ptr.vmem [resolvable:$true] %s903_s24 }
  0x43   : > { %v1697_v5 = vld [vmem:[%s1671_s6 + $0x28] sm:$0xff]  ;;  %v283_v6 = vadd.f32 %v1688_v2, %v1682_v0  ;;  %v1702_v7 = vld [vmem:[%s1671_s6 + $0x30] sm:$0xff]  ;;  %v304_v8 = vadd.f32 %v1691_v3, %v1685_v1  ;;  %v1707_v9 = vld [vmem:[%s1671_s6 + $0x38] sm:$0xff]  ;;  %s888_s18 = scalar_lea.sflag [#allocation4], %s1665_s21  ;;  %s1430_s29 = scalar_lea.vmem %s2184_s24, 4096 }
  0x44   : > { %v1711_v11 = vld [vmem:[%s1671_s6 + $0x40] sm:$0xff]  ;;  %v1715_v13 = vld [vmem:[%s1671_s6 + $0x48] sm:$0xff]  ;;  %v1719_v15 = vld [vmem:[%s1671_s6 + $0x50] sm:$0xff]  ;;  %p1431_p1 = scmp.ne.s32.totalorder %s2184_s24, %s1430_s29  ;;  %s1522_s12 = smov [#allocation7]  }
  0x45   : > { %v284_v10 = vadd.f32 %v283_v6, %v1694_v4  ;;  %v305_v12 = vadd.f32 %v304_v8, %v1697_v5  ;;  %v1723_v17 = vld [vmem:[%s1671_s6 + $0x58] sm:$0xff]  ;;  %v1727_v19 = vld [vmem:[%s1671_s6 + $0x60] sm:$0xff]  ;;  %v1731_v21 = vld [vmem:[%s1671_s6 + $0x68] sm:$0xff]  ;;  %s1434_s22 = sshll.u32 %s1522_s12, 4  ;;  %s1435_s22 = int_to_ptr.vmem [resolvable:$false] %s1434_s22 }
  0x46   : > { %v1735_v23 = vld [vmem:[%s1671_s6 + $0x70] sm:$0xff]  ;;  %v1739_v25 = vld [vmem:[%s1671_s6 + $0x78] sm:$0xff]  ;;  %v1743_v27 = vld [vmem:[%s1671_s6 + $0x80] sm:$0xff]  ;;  %p1432_p8 = pnand %p1431_p1, %p1637_p13  ;;  %s1436_s1 = scalar_lea.vmem %s1435_s22, 8192 }
  0x47   : > { %v285_v14 = vadd.f32 %v284_v10, %v1702_v7  ;;  %v306_v16 = vadd.f32 %v305_v12, %v1707_v9  ;;  %v1747_v29 = vld [vmem:[%s1671_s6 + $0x88] sm:$0xff]  ;;  %v1751_v31 = vld [vmem:[%s1671_s6 + $0x90] sm:$0xff]  ;;  %v1755_v33 = vld [vmem:[%s1671_s6 + $0x98] sm:$0xff]  ;;  %p1437_p0 = scmp.lt.s32.totalorder %s2184_s24, %s1435_s22  ;;  %p1438_p2 = scmp.lt.s32.totalorder %s1436_s1, %s1430_s29 }
  0x48   : > { %v1759_v35 = vld [vmem:[%s1671_s6 + $0xa0] sm:$0xff]  ;;  %v1763_v37 = vld [vmem:[%s1671_s6 + $0xa8] sm:$0xff]  ;;  %v1767_v39 = vld [vmem:[%s1671_s6 + $0xb0] sm:$0xff]  ;;  %p1433_p12 = pneg %p1432_p8 }
  0x49   : > { %v286_v18 = vadd.f32 %v285_v14, %v1711_v11  ;;  %v307_v20 = vadd.f32 %v306_v16, %v1715_v13  ;;  %v1771_v41 = vld [vmem:[%s1671_s6 + $0xb8] sm:$0xff]  ;;  %v1775_v43 = vld [vmem:[%s1671_s6 + $0xc0] sm:$0xff]  ;;  %v1779_v45 = vld [vmem:[%s1671_s6 + $0xc8] sm:$0xff]  ;;  %p1439_p3 = por %p1438_p2, %p1437_p0 }
  0x4a   : > { %v1783_v47 = vld [vmem:[%s1671_s6 + $0xd0] sm:$0xff]  ;;  %v1787_v49 = vld [vmem:[%s1671_s6 + $0xd8] sm:$0xff]  ;;  %v1791_v51 = vld [vmem:[%s1671_s6 + $0xe0] sm:$0xff] }
  0x4b   : > { %v287_v22 = vadd.f32 %v286_v18, %v1719_v15  ;;  %v308_v24 = vadd.f32 %v307_v20, %v1723_v17  ;;  %v1795_v53 = vld [vmem:[%s1671_s6 + $0xe8] sm:$0xff]  ;;  %v1799_v55 = vld [vmem:[%s1671_s6 + $0xf0] sm:$0xff]  ;;  %v1803_v57 = vld [vmem:[%s1671_s6 + $0xf8] sm:$0xff]  ;;  %p1440_p5 = pnand %p1439_p3, %p1433_p12 }
  0x4d   : > { %v288_v26 = vadd.f32 %v287_v22, %v1727_v19  ;;  %v309_v28 = vadd.f32 %v308_v24, %v1731_v21 }
  0x4f   : > { %v289_v30 = vadd.f32 %v288_v26, %v1735_v23  ;;  %v310_v32 = vadd.f32 %v309_v28, %v1739_v25 }
  0x51   : > { %v290_v34 = vadd.f32 %v289_v30, %v1743_v27  ;;  %v311_v36 = vadd.f32 %v310_v32, %v1747_v29 }
  0x53   : > { %v291_v38 = vadd.f32 %v290_v34, %v1751_v31  ;;  %v312_v40 = vadd.f32 %v311_v36, %v1755_v33 }
  0x55   : > { %v292_v42 = vadd.f32 %v291_v38, %v1759_v35  ;;  %v313_v44 = vadd.f32 %v312_v40, %v1763_v37 }
  0x57   : > { %v293_v46 = vadd.f32 %v292_v42, %v1767_v39  ;;  %v314_v48 = vadd.f32 %v313_v44, %v1771_v41  ;;  %v487_v42 = vld [vmem:[#allocation5 + $0x78] sm:$0xff] }
  0x58   : > { %1069 = vmatprep.subr.mxu0 %v487_v42  ;;  %1149 = vmatprep.subr.mxu1 %v487_v42 }
  0x59   : > { %v294_v50 = vadd.f32 %v293_v46, %v1775_v43  ;;  %v315_v52 = vadd.f32 %v314_v48, %v1779_v45  ;;  %v486_v48 = vld [vmem:[#allocation5 + $0x70] sm:$0xff]  ;;  %1070 = vmatpush3.msra.mxu0 %v487_v42  ;;  %1165 = vmatpush3.msra.mxu1 %v487_v42  ;;  %v481_v42 = vld [vmem:[#allocation5 + $0x48] sm:$0xff] }
  0x5a   : > { %1071 = vmatprep.subr.mxu0 %v486_v48  ;;  %1150 = vmatprep.subr.mxu1 %v486_v48 }
  0x5b   : > { %v295_v54 = vadd.f32 %v294_v50, %v1783_v47  ;;  %v316_v56 = vadd.f32 %v315_v52, %v1787_v49  ;;  %1072 = vmatpush3.msra.mxu0 %v486_v48  ;;  %1166 = vmatpush3.msra.mxu1 %v486_v48 }
  0x5d   : > { %v296_v58 = vadd.f32 %v295_v54, %v1791_v51  ;;  %v317_v59 = vadd.f32 %v316_v56, %v1795_v53 }
  0x5f   : > { %v297_v60 = vadd.f32 %v296_v58, %v1799_v55  ;;  %v318_v61 = vadd.f32 %v317_v59, %v1803_v57  ;;  %v485_v58 = vld [vmem:[#allocation5 + $0x68] sm:$0xff] }
  0x60   : > { %1073 = vmatprep.subr.mxu0 %v485_v58  ;;  %1151 = vmatprep.subr.mxu1 %v485_v58 }
  0x61   : > { %v298_v62 = vrot.slane %v297_v60, 4  ;;  %v319_v63 = vrot.slane %v318_v61, 4  ;;  %1074 = vmatpush3.msra.mxu0 %v485_v58  ;;  %1167 = vmatpush3.msra.mxu1 %v485_v58 }
  0x63   : > { %v299_v6 = vadd.f32 %v298_v62, %v297_v60  ;;  %v320_v8 = vadd.f32 %v319_v63, %v318_v61  ;;  %v484_v63 = vld [vmem:[#allocation5 + $0x60] sm:$0xff] }
  0x64   : > { %1075 = vmatprep.subr.mxu0 %v484_v63  ;;  %1152 = vmatprep.subr.mxu1 %v484_v63 }
  0x65   : > { %v300_v10 = vrot.slane %v299_v6, 2  ;;  %v321_v12 = vrot.slane %v320_v8, 2  ;;  %1076 = vmatpush3.msra.mxu0 %v484_v63  ;;  %1168 = vmatpush3.msra.mxu1 %v484_v63 }
  0x67   : > { %v301_v14 = vadd.f32 %v300_v10, %v299_v6  ;;  %v322_v16 = vadd.f32 %v321_v12, %v320_v8 }
  0x69   : > { %v302_v18 = vrot.slane %v301_v14, 1  ;;  %v323_v20 = vrot.slane %v322_v16, 1 }
  0x6b   : > { %v303_v22 = vadd.f32 %v302_v18, %v301_v14  ;;  %v324_v24 = vadd.f32 %v323_v20, %v322_v16  ;;  %v483_v14 = vld [vmem:[#allocation5 + $0x58] sm:$0xff] }
  0x6c   : > { %1077 = vmatprep.subr.mxu0 %v483_v14  ;;  %1153 = vmatprep.subr.mxu1 %v483_v14 }
  0x6d   : > { %v1809_v26 = vmul.f32 0.0078125, %v303_v22  ;;  %v1811_v28 = vmul.f32 0.0078125, %v324_v24  ;;  %v482_v24 = vld [vmem:[#allocation5 + $0x50] sm:$0xff]  ;;  %1078 = vmatpush3.msra.mxu0 %v483_v14  ;;  %1169 = vmatpush3.msra.mxu1 %v483_v14 }
  0x6e   : > { %1079 = vmatprep.subr.mxu0 %v482_v24  ;;  %1154 = vmatprep.subr.mxu1 %v482_v24 }
  0x6f   : > { %v1815_v30 = vsub.f32 %v1682_v0, %v1809_v26  ;;  %v1819_v32 = vsub.f32 %v1685_v1, %v1811_v28  ;;  %v1823_v34 = vsub.f32 %v1688_v2, %v1809_v26  ;;  %v1827_v36 = vsub.f32 %v1691_v3, %v1811_v28  ;;  %1080 = vmatpush3.msra.mxu0 %v482_v24 }
  0x70   : > { %v1831_v38 = vsub.f32 %v1694_v4, %v1809_v26  ;;  %v1835_v0 = vsub.f32 %v1697_v5, %v1811_v28  ;;  %v1839_v1 = vsub.f32 %v1702_v7, %v1809_v26  ;;  %v1843_v2 = vsub.f32 %v1707_v9, %v1811_v28  ;;  %1170 = vmatpush3.msra.mxu1 %v482_v24 }
  0x71   : > { %v360_v3 = vmul.f32 %v1815_v30, %v1815_v30  ;;  %v361_v40 = vmul.f32 %v1819_v32, %v1819_v32  ;;  %v362_v4 = vmul.f32 %v1823_v34, %v1823_v34  ;;  %v363_v5 = vmul.f32 %v1827_v36, %v1827_v36  ;;  %1081 = vmatprep.subr.mxu0 %v481_v42 }
  0x72   : > { %v1855_v7 = vsub.f32 %v1711_v11, %v1809_v26  ;;  %v1859_v9 = vsub.f32 %v1715_v13, %v1811_v28  ;;  %v364_v44 = vmul.f32 %v1831_v38, %v1831_v38  ;;  %v365_v46 = vmul.f32 %v1835_v0, %v1835_v0  ;;  %1155 = vmatprep.subr.mxu1 %v481_v42 }
  0x73   : > { %v1867_v50 = vsub.f32 %v1719_v15, %v1809_v26  ;;  %v1871_v11 = vsub.f32 %v1723_v17, %v1811_v28  ;;  %v366_v13 = vmul.f32 %v1839_v1, %v1839_v1  ;;  %v367_v52 = vmul.f32 %v1843_v2, %v1843_v2  ;;  %1082 = vmatpush3.msra.mxu0 %v481_v42 }
  0x74   : > { %v392_v54 = vadd.f32 %v362_v4, %v360_v3  ;;  %v413_v56 = vadd.f32 %v363_v5, %v361_v40  ;;  %v1879_v15 = vsub.f32 %v1727_v19, %v1809_v26  ;;  %v1883_v17 = vsub.f32 %v1731_v21, %v1811_v28  ;;  %1171 = vmatpush3.msra.mxu1 %v481_v42 }
  0x75   : > { %v368_v59 = vmul.f32 %v1855_v7, %v1855_v7  ;;  %v369_v60 = vmul.f32 %v1859_v9, %v1859_v9  ;;  %v1891_v19 = vsub.f32 %v1735_v23, %v1809_v26  ;;  %v1895_v21 = vsub.f32 %v1739_v25, %v1811_v28 }
  0x76   : > { %v393_v61 = vadd.f32 %v392_v54, %v364_v44  ;;  %v414_v62 = vadd.f32 %v413_v56, %v365_v46  ;;  %v370_v6 = vmul.f32 %v1867_v50, %v1867_v50  ;;  %v371_v8 = vmul.f32 %v1871_v11, %v1871_v11 }
  0x77   : > { %v1903_v23 = vsub.f32 %v1743_v27, %v1809_v26  ;;  %v1907_v25 = vsub.f32 %v1747_v29, %v1811_v28  ;;  %v372_v16 = vmul.f32 %v1879_v15, %v1879_v15  ;;  %v373_v18 = vmul.f32 %v1883_v17, %v1883_v17 }
  0x78   : > { %v394_v10 = vadd.f32 %v393_v61, %v366_v13  ;;  %v415_v12 = vadd.f32 %v414_v62, %v367_v52  ;;  %v1915_v27 = vsub.f32 %v1751_v31, %v1809_v26  ;;  %v1919_v29 = vsub.f32 %v1755_v33, %v1811_v28  ;;  %v480_v52 = vld [vmem:[#allocation5 + $0x40] sm:$0xff] }
  0x79   : > { %v374_v3 = vmul.f32 %v1891_v19, %v1891_v19  ;;  %v375_v40 = vmul.f32 %v1895_v21, %v1895_v21  ;;  %v1927_v31 = vsub.f32 %v1759_v35, %v1809_v26  ;;  %v1931_v33 = vsub.f32 %v1763_v37, %v1811_v28  ;;  %1083 = vmatprep.subr.mxu0 %v480_v52 }
  0x7a   : > { %v395_v20 = vadd.f32 %v394_v10, %v368_v59  ;;  %v416_v22 = vadd.f32 %v415_v12, %v369_v60  ;;  %v376_v44 = vmul.f32 %v1903_v23, %v1903_v23  ;;  %v377_v46 = vmul.f32 %v1907_v25, %v1907_v25  ;;  %v479_v60 = vld [vmem:[#allocation5 + $0x38] sm:$0xff]  ;;  %1156 = vmatprep.subr.mxu1 %v480_v52 }
  0x7b   : > { %v1939_v35 = vsub.f32 %v1767_v39, %v1809_v26  ;;  %v1943_v37 = vsub.f32 %v1771_v41, %v1811_v28  ;;  %v378_v54 = vmul.f32 %v1915_v27, %v1915_v27  ;;  %v379_v56 = vmul.f32 %v1919_v29, %v1919_v29  ;;  %1084 = vmatpush3.msra.mxu0 %v480_v52 }
  0x7c   : > { %v396_v4 = vadd.f32 %v395_v20, %v370_v6  ;;  %v417_v5 = vadd.f32 %v416_v22, %v371_v8  ;;  %v1951_v39 = vsub.f32 %v1775_v43, %v1809_v26  ;;  %v1955_v41 = vsub.f32 %v1779_v45, %v1811_v28  ;;  %1172 = vmatpush3.msra.mxu1 %v480_v52  ;;  %v478_v8 = vld [vmem:[#allocation5 + $0x30] sm:$0xff] }
  0x7d   : > { %v380_v61 = vmul.f32 %v1927_v31, %v1927_v31  ;;  %v381_v62 = vmul.f32 %v1931_v33, %v1931_v33  ;;  %v1963_v43 = vsub.f32 %v1783_v47, %v1809_v26  ;;  %v1967_v45 = vsub.f32 %v1787_v49, %v1811_v28  ;;  %1085 = vmatprep.subr.mxu0 %v479_v60 }
  0x7e   : > { %v397_v48 = vadd.f32 %v396_v4, %v372_v16  ;;  %v418_v13 = vadd.f32 %v417_v5, %v373_v18  ;;  %v382_v10 = vmul.f32 %v1939_v35, %v1939_v35  ;;  %1157 = vmatprep.subr.mxu1 %v479_v60  ;;  %v383_v12 = vmul.f32 %v1943_v37, %v1943_v37  ;;  %v477_v18 = vld [vmem:[#allocation5 + $0x28] sm:$0xff] }
  0x7f   : > { %1086 = vmatpush3.msra.mxu0 %v479_v60  ;;  %1173 = vmatpush3.msra.mxu1 %v479_v60  ;;  %v1975_v47 = vsub.f32 %v1791_v51, %v1809_v26  ;;  %v1979_v49 = vsub.f32 %v1795_v53, %v1811_v28  ;;  %v384_v20 = vmul.f32 %v1951_v39, %v1951_v39 }
  0x80   : > { %v398_v58 = vadd.f32 %v397_v48, %v374_v3  ;;  %v419_v59 = vadd.f32 %v418_v13, %v375_v40  ;;  %1087 = vmatprep.subr.mxu0 %v478_v8  ;;  %1158 = vmatprep.subr.mxu1 %v478_v8  ;;  %v385_v22 = vmul.f32 %v1955_v41, %v1955_v41  ;;  %v476_v40 = vld [vmem:[#allocation5 + $0x20] sm:$0xff] }
  0x81   : > { %1088 = vmatpush3.msra.mxu0 %v478_v8  ;;  %1174 = vmatpush3.msra.mxu1 %v478_v8  ;;  %v1987_v51 = vsub.f32 %v1799_v55, %v1809_v26  ;;  %v1991_v53 = vsub.f32 %v1803_v57, %v1811_v28  ;;  %v386_v4 = vmul.f32 %v1963_v43, %v1963_v43 }
  0x82   : > { %v399_v63 = vadd.f32 %v398_v58, %v376_v44  ;;  %v420_v6 = vadd.f32 %v419_v59, %v377_v46  ;;  %1089 = vmatprep.subr.mxu0 %v477_v18  ;;  %1159 = vmatprep.subr.mxu1 %v477_v18  ;;  %v387_v5 = vmul.f32 %v1967_v45, %v1967_v45  ;;  %v475_v46 = vld [vmem:[#allocation5 + $0x18] sm:$0xff] }
  0x83   : > { %1090 = vmatpush3.msra.mxu0 %v477_v18  ;;  %1175 = vmatpush3.msra.mxu1 %v477_v18  ;;  %v388_v55 = vmul.f32 %v1975_v47, %v1975_v47  ;;  %v389_v57 = vmul.f32 %v1979_v49, %v1979_v49  ;;  %v390_v48 = vmul.f32 %v1987_v51, %v1987_v51 }
  0x84   : > { %v400_v14 = vadd.f32 %v399_v63, %v378_v54  ;;  %v421_v16 = vadd.f32 %v420_v6, %v379_v56  ;;  %1091 = vmatprep.subr.mxu0 %v476_v40  ;;  %1160 = vmatprep.subr.mxu1 %v476_v40  ;;  %v391_v13 = vmul.f32 %v1991_v53, %v1991_v53 }
  0x85   : > { %1092 = vmatpush3.msra.mxu0 %v476_v40  ;;  %1176 = vmatpush3.msra.mxu1 %v476_v40 }
  0x86   : > { %v401_v24 = vadd.f32 %v400_v14, %v380_v61  ;;  %v422_v3 = vadd.f32 %v421_v16, %v381_v62  ;;  %1093 = vmatprep.subr.mxu0 %v475_v46  ;;  %1161 = vmatprep.subr.mxu1 %v475_v46 }
  0x87   : > { %1094 = vmatpush3.msra.mxu0 %v475_v46  ;;  %1177 = vmatpush3.msra.mxu1 %v475_v46 }
  0x88   : > { %v402_v42 = vadd.f32 %v401_v24, %v382_v10  ;;  %v423_v44 = vadd.f32 %v422_v3, %v383_v12 }
  0x8a   : > { %v403_v26 = vadd.f32 %v402_v42, %v384_v20  ;;  %v424_v28 = vadd.f32 %v423_v44, %v385_v22 }
  0x8c   : > { %v404_v52 = vadd.f32 %v403_v26, %v386_v4  ;;  %v425_v54 = vadd.f32 %v424_v28, %v387_v5  ;;  %v474_v26 = vld [vmem:[#allocation5 + $0x10] sm:$0xff] }
  0x8d   : > { %1095 = vmatprep.subr.mxu0 %v474_v26  ;;  %1162 = vmatprep.subr.mxu1 %v474_v26 }
  0x8e   : > { %v405_v56 = vadd.f32 %v404_v52, %v388_v55  ;;  %v426_v58 = vadd.f32 %v425_v54, %v389_v57  ;;  %1096 = vmatpush3.msra.mxu0 %v474_v26  ;;  %1178 = vmatpush3.msra.mxu1 %v474_v26  ;;  %v472_v52 = vld [vmem:[#allocation5] sm:$0xff] }
  0x90   : > { %v406_v59 = vadd.f32 %v405_v56, %v390_v48  ;;  %v427_v60 = vadd.f32 %v426_v58, %v391_v13  ;;  %v473_v48 = vld [vmem:[#allocation5 + $0x8] sm:$0xff] }
  0x91   : > { %1097 = vmatprep.subr.mxu0 %v473_v48  ;;  %1163 = vmatprep.subr.mxu1 %v473_v48 }
  0x92   : > { %v407_v61 = vrot.slane %v406_v59, 4  ;;  %v428_v62 = vrot.slane %v427_v60, 4  ;;  %1098 = vmatpush3.msra.mxu0 %v473_v48  ;;  %1179 = vmatpush3.msra.mxu1 %v473_v48 }
  0x93   : > { %1099 = vmatprep.subr.mxu0 %v472_v52  ;;  %1164 = vmatprep.subr.mxu1 %v472_v52 }
  0x94   : > { %v408_v63 = vadd.f32 %v407_v61, %v406_v59  ;;  %v429_v6 = vadd.f32 %v428_v62, %v427_v60  ;;  %1100 = vmatpush3.msra.mxu0 %v472_v52  ;;  %1180 = vmatpush3.msra.mxu1 %v472_v52 }
  0x96   : > { %v409_v8 = vrot.slane %v408_v63, 2  ;;  %v430_v10 = vrot.slane %v429_v6, 2 }
  0x98   : > { %v410_v12 = vadd.f32 %v409_v8, %v408_v63  ;;  %v431_v14 = vadd.f32 %v430_v10, %v429_v6 }
  0x9a   : > { %v411_v16 = vrot.slane %v410_v12, 1  ;;  %v432_v18 = vrot.slane %v431_v14, 1 }
  0x9c   : > { %v412_v20 = vadd.f32 %v411_v16, %v410_v12  ;;  %v433_v22 = vadd.f32 %v432_v18, %v431_v14 }
  0x9e   : > { %v434_v24 = vmul.f32 0.0078125, %v412_v20  ;;  %v435_v3 = vmul.f32 0.0078125, %v433_v22 }
  0xa0   : > { %v436_v40 = vadd.f32 1e-05, %v434_v24  ;;  %v437_v4 = vadd.f32 1e-05, %v435_v3 }
  0xa2   : > { %1372 = vrsqrt.f32 %v436_v40 }
  0xa3   : > { %1374 = vrsqrt.f32 %v437_v4 }
  0xaf   : > { %v2005_v5 = vpop.eup %1372 }
  0xb0   : > { %v2007_v42 = vpop.eup %1374  ;;  %v440_v44 = vmul.f32 %v2005_v5, %v1815_v30  ;;  %v442_v55 = vmul.f32 %v2005_v5, %v1823_v34  ;;  %v444_v30 = vmul.f32 %v2005_v5, %v1831_v38  ;;  %v446_v34 = vmul.f32 %v2005_v5, %v1839_v1 }
  0xb1   : > { %v441_v46 = vmul.f32 %v2007_v42, %v1819_v32  ;;  %v443_v57 = vmul.f32 %v2007_v42, %v1827_v36  ;;  %v445_v32 = vmul.f32 %v2007_v42, %v1835_v0  ;;  %v447_v36 = vmul.f32 %v2007_v42, %v1843_v2 }
  0xb2   : > { %v466_v56 = vmul.f32 %v2005_v5, %v1963_v43  ;;  %v467_v38 = vmul.f32 %v2007_v42, %v1967_v45  ;;  %v468_v0 = vmul.f32 %v2005_v5, %v1975_v47  ;;  %v469_v58 = vmul.f32 %v2007_v42, %v1979_v49 }
  0xb3   : > { %v1260_v28 = vpack.i.bf16 %v441_v46, %v440_v44  ;;  %v1262_v13 = vpack.i.bf16 %v443_v57, %v442_v55  ;;  %v1264_v54 = vpack.i.bf16 %v445_v32, %v444_v30  ;;  %v470_v1 = vmul.f32 %v2005_v5, %v1987_v51 }
  0xb4   : > { %v1286_v2 = vpack.i.bf16 %v467_v38, %v466_v56  ;;  %v471_v59 = vmul.f32 %v2007_v42, %v1991_v53  ;;  %v448_v43 = vmul.f32 %v2005_v5, %v1855_v7  ;;  %v1288_v45 = vpack.i.bf16 %v469_v58, %v468_v0 }
  0xb5   : > { %1261 = vxpose.xlu0.b32.start [1/16] %v1260_v28, 128  ;;  %v1266_v47 = vpack.i.bf16 %v447_v36, %v446_v34  ;;  %v449_v49 = vmul.f32 %v2007_v42, %v1859_v9  ;;  %v450_v53 = vmul.f32 %v2005_v5, %v1867_v50  ;;  %v451_v61 = vmul.f32 %v2007_v42, %v1871_v11 }
  0xb6   : > { %v1290_v60 = vpack.i.bf16 %v471_v59, %v470_v1  ;;  %v452_v62 = vmul.f32 %v2005_v5, %v1879_v15  ;;  %v453_v63 = vmul.f32 %v2007_v42, %v1883_v17  ;;  %v454_v6 = vmul.f32 %v2005_v5, %v1891_v19 }
  0xb7   : > { %v1268_v51 = vpack.i.bf16 %v449_v49, %v448_v43  ;;  %v1270_v7 = vpack.i.bf16 %v451_v61, %v450_v53  ;;  %v455_v8 = vmul.f32 %v2007_v42, %v1895_v21  ;;  %v456_v11 = vmul.f32 %v2005_v5, %v1903_v23 }
  0xb8   : > { %v1272_v9 = vpack.i.bf16 %v453_v63, %v452_v62  ;;  %v457_v10 = vmul.f32 %v2007_v42, %v1907_v25  ;;  %v458_v17 = vmul.f32 %v2005_v5, %v1915_v27  ;;  %v459_v12 = vmul.f32 %v2007_v42, %v1919_v29 }
  0xb9   : > { %1263 = vxpose.xlu0.b32.cont [2/16] %v1262_v13, 128  ;;  %v1274_v50 = vpack.i.bf16 %v455_v8, %v454_v6  ;;  %v460_v21 = vmul.f32 %v2005_v5, %v1927_v31  ;;  %v461_v14 = vmul.f32 %v2007_v42, %v1931_v33  ;;  %v462_v25 = vmul.f32 %v2005_v5, %v1939_v35 }
  0xba   : > { %v1276_v15 = vpack.i.bf16 %v457_v10, %v456_v11  ;;  %v1278_v19 = vpack.i.bf16 %v459_v12, %v458_v17  ;;  %v463_v16 = vmul.f32 %v2007_v42, %v1943_v37  ;;  %v464_v29 = vmul.f32 %v2005_v5, %v1951_v39  ;;  %v2081_v10 = vld [vmem:[%s2241_s3] ss:$0 sm:$0xff] }
  0xbb   : > { %v1280_v23 = vpack.i.bf16 %v461_v14, %v460_v21  ;;  %v465_v18 = vmul.f32 %v2007_v42, %v1955_v41 }
  0xbc   : > { %v1282_v27 = vpack.i.bf16 %v463_v16, %v462_v25 }
  0xbd   : > { %1265 = vxpose.xlu0.b32.cont [3/16] %v1264_v54, 128  ;;  %v1284_v31 = vpack.i.bf16 %v465_v18, %v464_v29 }
  0xc1   : > { %1267 = vxpose.xlu0.b32.cont [4/16] %v1266_v47, 128 }
  0xc5   : > { %1269 = vxpose.xlu0.b32.cont [5/16] %v1268_v51, 128 }
  0xc9   : > { %1271 = vxpose.xlu0.b32.cont [6/16] %v1270_v7, 128 }
  0xcd   : > { %1273 = vxpose.xlu0.b32.cont [7/16] %v1272_v9, 128 }
  0xd1   : > { %1275 = vxpose.xlu0.b32.cont [8/16] %v1274_v50, 128  ;;  %v2076_v50 = vld [vmem:[%s2240_s2] ss:$0 sm:$0xff] }
  0xd5   : > { %1277 = vxpose.xlu0.b32.cont [9/16] %v1276_v15, 128 }
  0xd9   : > { %1279 = vxpose.xlu0.b32.cont [10/16] %v1278_v19, 128 }
  0xdd   : > { %1281 = vxpose.xlu0.b32.cont [11/16] %v1280_v23, 128 }
  0xe1   : > { %1283 = vxpose.xlu0.b32.cont [12/16] %v1282_v27, 128 }
  0xe5   : > { %1285 = vxpose.xlu0.b32.cont [13/16] %v1284_v31, 128 }
  0xe9   : > { %1287 = vxpose.xlu0.b32.cont [14/16] %v1286_v2, 128 }
  0xed   : > { %1289 = vxpose.xlu0.b32.cont [15/16] %v1288_v45, 128 }
  0xf1   : > { %1291 = vxpose.xlu0.b32.end [16/16] %v1290_v60, 128 }
 0x131   : > { %v1292_v33 = vpop.trf.xlu0 }
 0x132   : > { %v1293_v20 = vunpack.i.l.bf16 %v1292_v33  ;;  %v1296_v35 = vunpack.i.h.bf16 %v1292_v33 }
 0x134   : > { %1101 = vmatprep.mubr.f32.mxu0 %v1293_v20  ;;  %1125 = vmatprep.mubr.f32.mxu1 %v1296_v35 }
 0x135   : > { %v1297_v37 = vpop.trf.xlu0 }
 0x136   : > { %v1298_v22 = vunpack.i.l.bf16 %v1297_v37  ;;  %v1301_v24 = vunpack.i.h.bf16 %v1297_v37 }
 0x138   : > { %1102 = vmatmul.mubr.f32.vlgmr.msra.gmra.mxu0 %v1298_v22  ;;  %1126 = vmatmul.mubr.f32.vlgmr.msra.gmra.mxu1 %v1301_v24 }
 0x139   : > { %v1302_v39 = vpop.trf.xlu0 }
 0x13a   : > { %v1303_v3 = vunpack.i.l.bf16 %v1302_v39  ;;  %v1306_v40 = vunpack.i.h.bf16 %v1302_v39 }
 0x13c   : > { %1104 = vmatprep.mubr.f32.mxu0 %v1303_v3  ;;  %1128 = vmatprep.mubr.f32.mxu1 %v1306_v40 }
 0x13d   : > { %v1307_v41 = vpop.trf.xlu0 }
 0x13e   : > { %v1308_v4 = vunpack.i.l.bf16 %v1307_v41  ;;  %v1311_v5 = vunpack.i.h.bf16 %v1307_v41 }
 0x140   : > { %1105 = vmatmul.mubr.f32.gmra.mxu0 %v1308_v4  ;;  %1129 = vmatmul.mubr.f32.gmra.mxu1 %v1311_v5 }
 0x141   : > { %v1312_v42 = vpop.trf.xlu0 }
 0x142   : > { %v1313_v44 = vunpack.i.l.bf16 %v1312_v42  ;;  %v1316_v46 = vunpack.i.h.bf16 %v1312_v42 }
 0x144   : > { %1107 = vmatprep.mubr.f32.mxu0 %v1313_v44  ;;  %1131 = vmatprep.mubr.f32.mxu1 %v1316_v46 }
 0x145   : > { %v1317_v55 = vpop.trf.xlu0 }
 0x146   : > { %v1318_v57 = vunpack.i.l.bf16 %v1317_v55  ;;  %v1321_v26 = vunpack.i.h.bf16 %v1317_v55 }
 0x148   : > { %1108 = vmatmul.mubr.f32.gmra.mxu0 %v1318_v57  ;;  %1132 = vmatmul.mubr.f32.gmra.mxu1 %v1321_v26 }
 0x149   : > { %v1322_v28 = vpop.trf.xlu0 }
 0x14a   : > { %v1323_v48 = vunpack.i.l.bf16 %v1322_v28  ;;  %v1326_v13 = vunpack.i.h.bf16 %v1322_v28 }
 0x14c   : > { %1110 = vmatprep.mubr.f32.mxu0 %v1323_v48  ;;  %1134 = vmatprep.mubr.f32.mxu1 %v1326_v13 }
 0x14d   : > { %v1327_v30 = vpop.trf.xlu0 }
 0x14e   : > { %v1328_v32 = vunpack.i.l.bf16 %v1327_v30  ;;  %v1331_v34 = vunpack.i.h.bf16 %v1327_v30 }
 0x150   : > { %1111 = vmatmul.mubr.f32.gmra.mxu0 %v1328_v32  ;;  %1135 = vmatmul.mubr.f32.gmra.mxu1 %v1331_v34 }
 0x151   : > { %v1332_v36 = vpop.trf.xlu0 }
 0x152   : > { %v1333_v52 = vunpack.i.l.bf16 %v1332_v36  ;;  %v1336_v54 = vunpack.i.h.bf16 %v1332_v36 }
 0x154   : > { %1113 = vmatprep.mubr.f32.mxu0 %v1333_v52  ;;  %1137 = vmatprep.mubr.f32.mxu1 %v1336_v54 }
 0x155   : > { %v1337_v56 = vpop.trf.xlu0 }
 0x156   : > { %v1338_v38 = vunpack.i.l.bf16 %v1337_v56  ;;  %v1341_v0 = vunpack.i.h.bf16 %v1337_v56 }
 0x158   : > { %1114 = vmatmul.mubr.f32.gmra.mxu0 %v1338_v38  ;;  %1138 = vmatmul.mubr.f32.gmra.mxu1 %v1341_v0 }
 0x159   : > { %v1342_v58 = vpop.trf.xlu0 }
 0x15a   : > { %v1343_v1 = vunpack.i.l.bf16 %v1342_v58  ;;  %v1346_v2 = vunpack.i.h.bf16 %v1342_v58 }
 0x15c   : > { %1116 = vmatprep.mubr.f32.mxu0 %v1343_v1  ;;  %1140 = vmatprep.mubr.f32.mxu1 %v1346_v2 }
 0x15d   : > { %v1347_v59 = vpop.trf.xlu0 }
 0x15e   : > { %v1348_v43 = vunpack.i.l.bf16 %v1347_v59  ;;  %v1351_v45 = vunpack.i.h.bf16 %v1347_v59 }
 0x160   : > { %1117 = vmatmul.mubr.f32.gmra.mxu0 %v1348_v43  ;;  %1141 = vmatmul.mubr.f32.gmra.mxu1 %v1351_v45 }
 0x161   : > { %v1352_v47 = vpop.trf.xlu0 }
 0x162   : > { %v1353_v49 = vunpack.i.l.bf16 %v1352_v47  ;;  %v1356_v60 = vunpack.i.h.bf16 %v1352_v47 }
 0x164   : > { %1119 = vmatprep.mubr.f32.mxu0 %v1353_v49  ;;  %1143 = vmatprep.mubr.f32.mxu1 %v1356_v60 }
 0x165   : > { %v1357_v51 = vpop.trf.xlu0 }
 0x166   : > { %v1358_v53 = vunpack.i.l.bf16 %v1357_v51  ;;  %v1361_v61 = vunpack.i.h.bf16 %v1357_v51 }
 0x168   : > { %1120 = vmatmul.mubr.f32.gmra.mxu0 %v1358_v53  ;;  %1144 = vmatmul.mubr.f32.gmra.mxu1 %v1361_v61 }
 0x169   : > { %v1362_v7 = vpop.trf.xlu0 }
 0x16a   : > { %v1363_v62 = vunpack.i.l.bf16 %v1362_v7  ;;  %v1366_v63 = vunpack.i.h.bf16 %v1362_v7 }
 0x16c   : > { %1122 = vmatprep.mubr.f32.mxu0 %v1363_v62  ;;  %1146 = vmatprep.mubr.f32.mxu1 %v1366_v63 }
 0x16d   : > { %v1367_v9 = vpop.trf.xlu0 }
 0x16e   : > { %v1371_v6 = vunpack.i.h.bf16 %v1367_v9  ;;  %v1368_v8 = vunpack.i.l.bf16 %v1367_v9 }
 0x170   : > { %1123 = vmatmul.mubr.f32.gmra.mxu0 %v1368_v8  ;;  %1147 = vmatmul.mubr.f32.gmra.mxu1 %v1371_v6 }
 0x1f8   : > { %v1103_v11 = vpop.f32.mrf.mxu0  ;;  %v1127_v15 = vpop.f32.mrf.mxu1 }
 0x1f9   : > { %v785_v17 = vmul.f32 %v1103_v11, %v2076_v50  ;;  %v801_v12 = vmul.f32 %v1127_v15, %v2076_v50 }
 0x1fa   : > { %v618_v19 = vpop.f32.mrf.mxu0  ;;  %v698_v21 = vpop.f32.mrf.mxu1 }
 0x1fb   : > { %v824_v14 = vadd.f32 %v2081_v10, %v785_v17  ;;  %v840_v23 = vadd.f32 %v2081_v10, %v801_v12  ;;  %v784_v25 = vmul.f32 %v2076_v50, %v618_v19  ;;  %v800_v16 = vmul.f32 %v2076_v50, %v698_v21 }
 0x1fd   : > { %856 = vst [vmem:[%s2091_s8 + $0x8] sm:$0xff] %v824_v14  ;;  %872 = vst [vmem:[%s2091_s8 + $0x88] sm:$0xff] %v840_v23  ;;  %v823_v27 = vadd.f32 %v2081_v10, %v784_v25  ;;  %v839_v29 = vadd.f32 %v2081_v10, %v800_v16 }
 0x1ff   : > { %855 = vst [vmem:[%s2091_s8] sm:$0xff] %v823_v27  ;;  %871 = vst [vmem:[%s2091_s8 + $0x80] sm:$0xff] %v839_v29 }
 0x200   : > { %v1106_v18 = vpop.f32.mrf.mxu0  ;;  %v1130_v31 = vpop.f32.mrf.mxu1 }
 0x201   : > { %v787_v33 = vmul.f32 %v1106_v18, %v2076_v50  ;;  %v803_v20 = vmul.f32 %v1130_v31, %v2076_v50 }
 0x202   : > { %v628_v35 = vpop.f32.mrf.mxu0  ;;  %v708_v37 = vpop.f32.mrf.mxu1 }
 0x203   : > { %v826_v22 = vadd.f32 %v2081_v10, %v787_v33  ;;  %v842_v24 = vadd.f32 %v2081_v10, %v803_v20  ;;  %v786_v39 = vmul.f32 %v2076_v50, %v628_v35  ;;  %v802_v3 = vmul.f32 %v2076_v50, %v708_v37 }
 0x205   : > { %858 = vst [vmem:[%s2091_s8 + $0x18] sm:$0xff] %v826_v22  ;;  %874 = vst [vmem:[%s2091_s8 + $0x98] sm:$0xff] %v842_v24  ;;  %v825_v40 = vadd.f32 %v2081_v10, %v786_v39  ;;  %v841_v41 = vadd.f32 %v2081_v10, %v802_v3 }
 0x207   : > { %857 = vst [vmem:[%s2091_s8 + $0x10] sm:$0xff] %v825_v40  ;;  %873 = vst [vmem:[%s2091_s8 + $0x90] sm:$0xff] %v841_v41 }
 0x208   : > { %v1109_v4 = vpop.f32.mrf.mxu0  ;;  %v1133_v5 = vpop.f32.mrf.mxu1 }
 0x209   : > { %v789_v42 = vmul.f32 %v1109_v4, %v2076_v50  ;;  %v805_v44 = vmul.f32 %v1133_v5, %v2076_v50 }
 0x20a   : > { %v638_v46 = vpop.f32.mrf.mxu0  ;;  %v718_v55 = vpop.f32.mrf.mxu1 }
 0x20b   : > { %v828_v57 = vadd.f32 %v2081_v10, %v789_v42  ;;  %v844_v26 = vadd.f32 %v2081_v10, %v805_v44  ;;  %v788_v28 = vmul.f32 %v2076_v50, %v638_v46  ;;  %v804_v48 = vmul.f32 %v2076_v50, %v718_v55 }
 0x20d   : > { %860 = vst [vmem:[%s2091_s8 + $0x28] sm:$0xff] %v828_v57  ;;  %876 = vst [vmem:[%s2091_s8 + $0xa8] sm:$0xff] %v844_v26  ;;  %v827_v13 = vadd.f32 %v2081_v10, %v788_v28  ;;  %v843_v30 = vadd.f32 %v2081_v10, %v804_v48 }
 0x20f   : > { %859 = vst [vmem:[%s2091_s8 + $0x20] sm:$0xff] %v827_v13  ;;  %875 = vst [vmem:[%s2091_s8 + $0xa0] sm:$0xff] %v843_v30 }
 0x210   : > { %v1112_v32 = vpop.f32.mrf.mxu0  ;;  %v1136_v34 = vpop.f32.mrf.mxu1 }
 0x211   : > { %v791_v36 = vmul.f32 %v1112_v32, %v2076_v50  ;;  %v807_v52 = vmul.f32 %v1136_v34, %v2076_v50 }
 0x212   : > { %v648_v54 = vpop.f32.mrf.mxu0  ;;  %v728_v56 = vpop.f32.mrf.mxu1 }
 0x213   : > { %v830_v38 = vadd.f32 %v2081_v10, %v791_v36  ;;  %v846_v0 = vadd.f32 %v2081_v10, %v807_v52  ;;  %v790_v58 = vmul.f32 %v2076_v50, %v648_v54  ;;  %v806_v1 = vmul.f32 %v2076_v50, %v728_v56 }
 0x215   : > { %862 = vst [vmem:[%s2091_s8 + $0x38] sm:$0xff] %v830_v38  ;;  %878 = vst [vmem:[%s2091_s8 + $0xb8] sm:$0xff] %v846_v0  ;;  %v829_v2 = vadd.f32 %v2081_v10, %v790_v58  ;;  %v845_v59 = vadd.f32 %v2081_v10, %v806_v1 }
 0x217   : > { %861 = vst [vmem:[%s2091_s8 + $0x30] sm:$0xff] %v829_v2  ;;  %877 = vst [vmem:[%s2091_s8 + $0xb0] sm:$0xff] %v845_v59 }
 0x218   : > { %v1115_v43 = vpop.f32.mrf.mxu0  ;;  %v1139_v45 = vpop.f32.mrf.mxu1 }
 0x219   : > { %v793_v47 = vmul.f32 %v1115_v43, %v2076_v50  ;;  %v809_v49 = vmul.f32 %v1139_v45, %v2076_v50 }
 0x21a   : > { %v658_v60 = vpop.f32.mrf.mxu0  ;;  %v738_v51 = vpop.f32.mrf.mxu1 }
 0x21b   : > { %v832_v53 = vadd.f32 %v2081_v10, %v793_v47  ;;  %v848_v61 = vadd.f32 %v2081_v10, %v809_v49  ;;  %v792_v7 = vmul.f32 %v2076_v50, %v658_v60  ;;  %v808_v62 = vmul.f32 %v2076_v50, %v738_v51 }
 0x21d   : > { %864 = vst [vmem:[%s2091_s8 + $0x48] sm:$0xff] %v832_v53  ;;  %880 = vst [vmem:[%s2091_s8 + $0xc8] sm:$0xff] %v848_v61  ;;  %v831_v63 = vadd.f32 %v2081_v10, %v792_v7  ;;  %v847_v9 = vadd.f32 %v2081_v10, %v808_v62 }
 0x21f   : > { %863 = vst [vmem:[%s2091_s8 + $0x40] sm:$0xff] %v831_v63  ;;  %879 = vst [vmem:[%s2091_s8 + $0xc0] sm:$0xff] %v847_v9 }
 0x220   : > { %v1118_v6 = vpop.f32.mrf.mxu0  ;;  %v1142_v8 = vpop.f32.mrf.mxu1 }
 0x221   : > { %v795_v11 = vmul.f32 %v1118_v6, %v2076_v50  ;;  %v811_v15 = vmul.f32 %v1142_v8, %v2076_v50 }
 0x222   : > { %v668_v17 = vpop.f32.mrf.mxu0  ;;  %v748_v12 = vpop.f32.mrf.mxu1 }
 0x223   : > { %v834_v19 = vadd.f32 %v2081_v10, %v795_v11  ;;  %v850_v21 = vadd.f32 %v2081_v10, %v811_v15  ;;  %v794_v14 = vmul.f32 %v2076_v50, %v668_v17  ;;  %v810_v23 = vmul.f32 %v2076_v50, %v748_v12 }
 0x225   : > { %866 = vst [vmem:[%s2091_s8 + $0x58] sm:$0xff] %v834_v19  ;;  %882 = vst [vmem:[%s2091_s8 + $0xd8] sm:$0xff] %v850_v21  ;;  %v833_v25 = vadd.f32 %v2081_v10, %v794_v14  ;;  %v849_v16 = vadd.f32 %v2081_v10, %v810_v23 }
 0x227   : > { %865 = vst [vmem:[%s2091_s8 + $0x50] sm:$0xff] %v833_v25  ;;  %881 = vst [vmem:[%s2091_s8 + $0xd0] sm:$0xff] %v849_v16 }
 0x228   : > { %v1121_v27 = vpop.f32.mrf.mxu0  ;;  %v1145_v29 = vpop.f32.mrf.mxu1 }
 0x229   : > { %v797_v18 = vmul.f32 %v1121_v27, %v2076_v50  ;;  %v813_v31 = vmul.f32 %v1145_v29, %v2076_v50 }
 0x22a   : > { %v678_v33 = vpop.f32.mrf.mxu0  ;;  %v758_v20 = vpop.f32.mrf.mxu1 }
 0x22b   : > { %v836_v35 = vadd.f32 %v2081_v10, %v797_v18  ;;  %v852_v37 = vadd.f32 %v2081_v10, %v813_v31  ;;  %v796_v22 = vmul.f32 %v2076_v50, %v678_v33  ;;  %v812_v24 = vmul.f32 %v2076_v50, %v758_v20 }
 0x22d   : > { %868 = vst [vmem:[%s2091_s8 + $0x68] sm:$0xff] %v836_v35  ;;  %884 = vst [vmem:[%s2091_s8 + $0xe8] sm:$0xff] %v852_v37  ;;  %v835_v39 = vadd.f32 %v2081_v10, %v796_v22  ;;  %v851_v3 = vadd.f32 %v2081_v10, %v812_v24 }
 0x22f   : > { %867 = vst [vmem:[%s2091_s8 + $0x60] sm:$0xff] %v835_v39  ;;  %883 = vst [vmem:[%s2091_s8 + $0xe0] sm:$0xff] %v851_v3 }
 0x230   : > { %v1124_v40 = vpop.f32.mrf.mxu0  ;;  %v1148_v41 = vpop.f32.mrf.mxu1 }
 0x231   : > { %v799_v4 = vmul.f32 %v1124_v40, %v2076_v50  ;;  %v815_v5 = vmul.f32 %v1148_v41, %v2076_v50 }
 0x232   : > { %v688_v42 = vpop.f32.mrf.mxu0  ;;  %v768_v44 = vpop.f32.mrf.mxu1 }
 0x233   : > { %v838_v46 = vadd.f32 %v2081_v10, %v799_v4  ;;  %v854_v55 = vadd.f32 %v2081_v10, %v815_v5  ;;  %v798_v57 = vmul.f32 %v2076_v50, %v688_v42  ;;  %v814_v26 = vmul.f32 %v2076_v50, %v768_v44 }
 0x235   : > { %870 = vst [vmem:[%s2091_s8 + $0x78] sm:$0xff] %v838_v46  ;;  %886 = vst [vmem:[%s2091_s8 + $0xf8] sm:$0xff] %v854_v55  ;;  %v837_v28 = vadd.f32 %v2081_v10, %v798_v57  ;;  %v853_v48 = vadd.f32 %v2081_v10, %v814_v26 }
 0x237   : > { %869 = vst [vmem:[%s2091_s8 + $0x70] sm:$0xff] %v837_v28  ;;  %885 = vst [vmem:[%s2091_s8 + $0xf0] sm:$0xff] %v853_v48 }
 0x238   : > { %1443 = shalt.err (!%p1440_p5)
}
 0x239   : > { %s1444_s30 = scalar_lea.hbm %s2182_s11, 4096  ;;  %s1448_s25 = scalar_lea.hbm %s2242_s4, 8192 }
 0x23a   : > { %p1445_p7 = scmp.ne.s32.totalorder %s2182_s11, %s1444_s30  ;;  %p1449_p9 = scmp.lt.s32.totalorder %s2182_s11, %s2242_s4 }
 0x23b   : > { %p1450_p11 = scmp.lt.s32.totalorder %s1448_s25, %s1444_s30 }
 0x23c   : > { %p1446_p6 = pnand %p1445_p7, %p1637_p13 }
 0x23d   : > { %p1451_p10 = por %p1450_p11, %p1449_p9 }
 0x23e   : > { %p1447_p4 = pneg %p1446_p6 }
 0x240   : > { %p1452_p1 = pnand %p1451_p10, %p1447_p4 }
 0x242   : > { %1455 = shalt.err (!%p1452_p1)
}
 0x243   : > { %s1523_s8 = smov 128   ;;  %s1524_s9 = smov 8  }
 0x244   : > { %1187 = dma.vmem_to_hbm [thread:$0]  (%p1637_p13), %s2184_s24, 4096, %s2182_s11, %s888_s18, %s1523_s8, %s1523_s8, %s1524_s9  }
 0x245 PF: > { %s918_s10 = sand.u32 1, %s1494_s15   ;;  %p2256_p8 = scmp.ne.s32.totalorder %s2248_s26, 0 }
 0x246   : > { %p2257_p12 = scmp.ge.s32.totalorder %s1514_s20, 2  ;;  %s919_s14 = scalar_lea.sflag [#allocation4], %s918_s10 }
 0x248   : > { %p1198_p0 = pnand %p2257_p12, %p2256_p8 }
 0x24a   : > { %p1199_p2 = pneg %p1198_p0 }
 0x24c   : > { %1489 = dma.done.wait (%p1199_p2), %s919_s14, 4096  }
 0x24d   : > { %1491 = vsyncadd (%p1199_p2), %s919_s14, 4294963200  ;;  %s21_s20 = sadd.s32 1, %s1514_s20   ;;  %s2258_s15 = smov %s1498_s16 }
 0x24e   : > { %p18_p3 = scmp.ge.s32.totalorder %s21_s20, 4   ;;  %s2259_s16 = smov %s1502_s17 }
 0x24f   : > { %s2260_s17 = smov %s1646_s28  ;;  %s2261_s18 = smov %s1510_s19 }
 0x250   : > { %s2262_s19 = smov %s2264_s5  ;;  %20 = sbr.rel (!%p18_p3) target bundleno = 9 (0x9), region = 85 }
 0x255   :  { %924 = vsyncpa [#allocation3], 1 }
 0x256   :  { %926 = vsyncpa [#allocation3 + $0x1], 1 }
 0x257   :  { %927 = vsyncpa [#allocation6], 1 }
 0x258   :  { %928 = vsyncpa [#allocation4], 1 }
 0x259   :  { %930 = vsyncpa [#allocation4 + $0x1], 1 }

</bundles_post_ra>
